<compile_context>
chip_gen: v5e
topology: v5e:2x2
jax: 0.10.0
libtpu: 0.0.40
codegen_flags: <defaults>
</compile_context>

<pallas_src>
import functools

import jax
import jax.numpy as jnp
from jax.experimental import pallas as pl
from jax.experimental.pallas import tpu as pltpu

DIM = 2
HID = 64


def _elu(z):
    # ELU with alpha=1.0 (PyTorch default); exp only on the clamped branch.
    return jnp.where(z > 0, z, jnp.exp(jnp.minimum(z, 0.0)) - 1.0)


def _round_up(x, m):
    return ((x + m - 1) // m) * m


def _cdiv(a, b):
    return -(-a // b)


def _has_bf16_vpu():
    """True for TPU generations with bf16 VALU/EUP (v6e / v7x)."""
    try:
        kind = jax.devices()[0].device_kind.lower()
    except Exception:
        return False
    if any(g in kind for g in ("v2", "v3", "v4", "v5")):
        return False
    return ("v6" in kind) or ("v7" in kind)


def flow_mlp_kernel(z_ref, w1_ref, b1_ref, w2_ref, b2_ref, w3_ref, b3_ref,
                    w4_ref, b4_ref, out_ref, *, chunk, unroll):
    """Feature-major MLP.  z_ref is (dim+1, TB) with row 0 = t, rows 1.. = x."""
    # Weights are tiny (<= 64x64); load once per grid step, reuse across chunks.
    w1 = w1_ref[...]   # (h, dim+1)  f32   -- layer 1 stays f32 (input precision)
    b1 = b1_ref[...]   # (h, 1)      act dtype
    w2 = w2_ref[...]   # (h, h)      matmul dtype
    b2 = b2_ref[...]   # (h, 1)      act dtype
    w3 = w3_ref[...]   # (h, h)      matmul dtype
    b3 = b3_ref[...]   # (h, 1)      act dtype
    w4 = w4_ref[...]   # (dim, h)    matmul dtype
    b4 = b4_ref[...]   # (dim, 1)    f32

    adt = b1.dtype     # activation (bias + ELU) dtype: bf16 on v6e/v7x, else f32
    mdt = w2.dtype     # MXU input dtype for the 64x64 layers
    n_chunks = z_ref.shape[-1] // chunk   # static

    def body(c, carry):
        s = pl.multiple_of(c * chunk, chunk)                     # lane-aligned start
        z = z_ref[:, pl.ds(s, chunk)]                            # (dim+1, chunk) f32

        # layer 1: Linear(dim+1, h) on cat((t, x)), K = 3, f32 matmul on the MXU
        a1 = jnp.dot(w1, z, preferred_element_type=jnp.float32)  # (h, chunk) f32
        h1 = _elu(a1.astype(adt) + b1).astype(mdt)
        a2 = jnp.dot(w2, h1, preferred_element_type=jnp.float32)
        h2 = _elu(a2.astype(adt) + b2).astype(mdt)
        a3 = jnp.dot(w3, h2, preferred_element_type=jnp.float32)
        h3 = _elu(a3.astype(adt) + b3).astype(mdt)
        y = jnp.dot(w4, h3, preferred_element_type=jnp.float32) + b4  # (dim, chunk)

        out_ref[:, pl.ds(s, chunk)] = y.astype(out_ref.dtype)    # lane-dense store
        return carry

    jax.lax.fori_loop(0, n_chunks, body, 0, unroll=unroll)


def flow_forward_feature_major(zT, params, *, tile_b=16384, chunk=256, lane=256,
                               matmul_dtype=jnp.bfloat16, act_dtype=None,
                               out_dtype=None, unroll=4):
    """Feature-major forward: zT is (dim+1, B) with row 0 = t, rows 1.. = x_t.

    Returns (dim, B).  Callers in ODE-integration loops that already keep
    feature-major layout should use this entry point directly and skip the
    wrapper transposes in `flow_forward`.
    """
    (w1, b1), (w2, b2), (w3, b3), (w4, b4) = params
    din, B = zT.shape
    h = w1.shape[0]
    dout = w4.shape[0]
    assert w1.shape[1] == din, (w1.shape, din)
    out_dtype = zT.dtype if out_dtype is None else out_dtype

    mdt = jnp.float32 if matmul_dtype is None else jnp.dtype(matmul_dtype)
    if act_dtype is None:
        # bf16 bias/ELU only where the VPU/EUP support it (v6e/v7x); f32 on v5e.
        adt = mdt if (mdt != jnp.dtype(jnp.float32) and _has_bf16_vpu()) else jnp.float32
    else:
        adt = jnp.dtype(act_dtype)

    # ---- tile sizing -------------------------------------------------------
    # lane=256 matches the v6e/v7x MXU output width (128 would suffice on v5e).
    lane = max(128, int(lane))
    tile_b = max(lane, _round_up(int(tile_b), lane))
    b_rounded = _round_up(B, lane)
    n_tiles = max(1, _cdiv(b_rounded, tile_b))
    if b_rounded >= 2 * lane:
        # keep >= 2 grid steps so v7x's two TensorCores both get work.
        n_tiles = max(n_tiles, 2)
    tile_b_eff = _round_up(_cdiv(b_rounded, n_tiles), lane)
    B_pad = tile_b_eff * n_tiles
    chunk_eff = min(int(chunk), tile_b_eff)
    if tile_b_eff % chunk_eff != 0:
        chunk_eff = lane
    n_chunks = tile_b_eff // chunk_eff
    unroll_eff = max(1, min(int(unroll), n_chunks))   # partial unroll, not full

    if B_pad != B:
        # zero padding -> padded columns stay finite through ELU; sliced off below.
        zT = jnp.pad(zT, ((0, 0), (0, B_pad - B)))

    # ---- pre-cast params once in the wrapper (no per-grid-step casts) ------
    w1c = w1.astype(jnp.float32)
    b1c = b1.reshape(h, 1).astype(adt)
    w2c = w2.astype(mdt)
    b2c = b2.reshape(h, 1).astype(adt)
    w3c = w3.astype(mdt)
    b3c = b3.reshape(h, 1).astype(adt)
    w4c = w4.astype(mdt)
    b4c = b4.reshape(dout, 1).astype(jnp.float32)

    grid = (B_pad // tile_b_eff,)
    full = lambda a: pl.BlockSpec(a.shape, lambda i: (0,) * a.ndim)

    kernel = functools.partial(flow_mlp_kernel, chunk=chunk_eff, unroll=unroll_eff)

    yT = pl.pallas_call(
        kernel,
        out_shape=jax.ShapeDtypeStruct((dout, B_pad), out_dtype),
        grid_spec=pltpu.PrefetchScalarGridSpec(
            num_scalar_prefetch=0,
            grid=grid,
            in_specs=[
                pl.BlockSpec((din, tile_b_eff), lambda i: (0, i)),   # [t; x] tile
                full(w1c), full(b1c),
                full(w2c), full(b2c),
                full(w3c), full(b3c),
                full(w4c), full(b4c),
            ],
            out_specs=pl.BlockSpec((dout, tile_b_eff), lambda i: (0, i)),
        ),
        compiler_params=pltpu.CompilerParams(
            dimension_semantics=("parallel",)),   # lets v7x split the grid over 2 TCs
    )(zT, w1c, b1c, w2c, b2c, w3c, b3c, w4c, b4c)

    return yT[:, :B]


def flow_forward(x_t, t, params, *, use_pallas=None, **kwargs):
    """Equivalent of Flow.forward: net(cat((t, x_t), dim=-1)).

    x_t: [B, dim], t: [B, 1]  (same layout as the PyTorch module).
    Small batches (< 1024) default to the plain-jnp path (kernel launch and
    lane padding dominate there); pass use_pallas=True to force the kernel.
    """
    B = x_t.shape[0]
    if use_pallas is None:
        use_pallas = B >= 1024
    if not use_pallas:
        return flow_forward_ref(x_t, t, params).astype(x_t.dtype)
    # TODO(synk): callers that already hold feature-major [dim+1, B] data should
    # call flow_forward_feature_major directly to avoid these transposes.
    zT = jnp.concatenate([t, x_t], axis=-1).T          # [dim+1, B]
    yT = flow_forward_feature_major(zT, params, **kwargs)
    return yT.T                                        # back to [B, dim]


def init_params(key, dim=DIM, h=HID, dtype=jnp.float32):
    """Deterministic synthetic init of the 4 Linear layers.

    Weights stored PyTorch-style [out, in]; biases stored as [out, 1] columns
    to match the feature-major kernel layout.
    """
    sizes = [(dim + 1, h), (h, h), (h, h), (h, dim)]
    params = []
    for (fan_in, fan_out) in sizes:
        key, kw, kb = jax.random.split(key, 3)
        bound = 1.0 / jnp.sqrt(fan_in)
        w = jax.random.uniform(kw, (fan_out, fan_in), dtype, -bound, bound)
        b = jax.random.uniform(kb, (fan_out, 1), dtype, -bound, bound)
        params.append((w, b))
    return params


def flow_forward_ref(x_t, t, params):
    """Plain-JAX reference (mirrors the PyTorch forward exactly)."""
    (w1, b1), (w2, b2), (w3, b3), (w4, b4) = params
    z = jnp.concatenate([t, x_t], axis=-1)
    z = _elu(z @ w1.T + b1.reshape(1, -1))
    z = _elu(z @ w2.T + b2.reshape(1, -1))
    z = _elu(z @ w3.T + b3.reshape(1, -1))
    return z @ w4.T + b4.reshape(1, -1)


if __name__ == "__main__":
    key = jax.random.PRNGKey(0)
    kp, kx, kt = jax.random.split(key, 3)

    params = init_params(kp)

    # --- small shape (typical Flow usage); force the Pallas path -------------
    B = 8
    x_t = jax.random.normal(kx, (B, DIM), jnp.float32)
    t = jax.random.uniform(kt, (B, 1), jnp.float32)
    ref = flow_forward_ref(x_t, t, params)

    # full-f32 path: tight plumbing/correctness check
    out_f32 = flow_forward(x_t, t, params, use_pallas=True,
                           matmul_dtype=jnp.float32)
    out_f32 = jax.block_until_ready(out_f32)
    assert out_f32.shape == (B, DIM), out_f32.shape
    assert jnp.allclose(out_f32, ref, atol=1e-5, rtol=1e-5), \
        float(jnp.max(jnp.abs(out_f32 - ref)))

    # default path: bf16 MXU everywhere, bf16 bias/ELU only on v6e/v7x
    out_def = jax.block_until_ready(
        flow_forward(x_t, t, params, use_pallas=True))
    assert jnp.allclose(out_def, ref, atol=1e-1, rtol=1e-1), \
        float(jnp.max(jnp.abs(out_def - ref)))

    # --- larger, lane-unaligned batch: multi-step grid + chunked/unrolled loop
    B2 = 6000
    kx2, kt2 = jax.random.split(jax.random.PRNGKey(1))
    x2 = jax.random.normal(kx2, (B2, DIM), jnp.float32)
    t2 = jax.random.uniform(kt2, (B2, 1), jnp.float32)
    ref2 = flow_forward_ref(x2, t2, params)

    out2 = jax.block_until_ready(
        flow_forward(x2, t2, params, matmul_dtype=jnp.float32, tile_b=2048))
    assert out2.shape == (B2, DIM)
    assert jnp.allclose(out2, ref2, atol=1e-4, rtol=1e-4), \
        float(jnp.max(jnp.abs(out2 - ref2)))

    out2_def = jax.block_until_ready(flow_forward(x2, t2, params))  # default tile
    assert jnp.allclose(out2_def, ref2, atol=1e-1, rtol=1e-1), \
        float(jnp.max(jnp.abs(out2_def - ref2)))

    print("KERNEL_OK")
</pallas_src>

<mosaic_0001>
module attributes {stable_mosaic.version = 11 : i64} {
  func.func @flow_mlp_kernel(%arg0: i32, %arg1: memref<3x256xf32, #tpu.memory_space<vmem>>, %arg2: memref<64x3xf32, #tpu.memory_space<vmem>>, %arg3: memref<64x1xf32, #tpu.memory_space<vmem>>, %arg4: memref<64x64xf32, #tpu.memory_space<vmem>>, %arg5: memref<64x1xf32, #tpu.memory_space<vmem>>, %arg6: memref<64x64xf32, #tpu.memory_space<vmem>>, %arg7: memref<64x1xf32, #tpu.memory_space<vmem>>, %arg8: memref<2x64xf32, #tpu.memory_space<vmem>>, %arg9: memref<2x1xf32, #tpu.memory_space<vmem>>, %arg10: memref<2x256xf32, #tpu.memory_space<vmem>>) attributes {dimension_semantics = [#tpu.dimension_semantics<parallel>], iteration_bounds = array<i64: 1>, scalar_prefetch = 0 : i64, scratch_operands = 0 : i64, tpu.core_type = #tpu.core_type<tc>, window_params = [{transform_indices = @transform_0, window_bounds = array<i64: 3, 256>}, {pipeline_mode = #tpu.pipeline_mode<synchronous>, transform_indices = @transform_1, window_bounds = array<i64: 64, 3>}, {pipeline_mode = #tpu.pipeline_mode<synchronous>, transform_indices = @transform_2, window_bounds = array<i64: 64, 1>}, {pipeline_mode = #tpu.pipeline_mode<synchronous>, transform_indices = @transform_3, window_bounds = array<i64: 64, 64>}, {pipeline_mode = #tpu.pipeline_mode<synchronous>, transform_indices = @transform_4, window_bounds = array<i64: 64, 1>}, {pipeline_mode = #tpu.pipeline_mode<synchronous>, transform_indices = @transform_5, window_bounds = array<i64: 64, 64>}, {pipeline_mode = #tpu.pipeline_mode<synchronous>, transform_indices = @transform_6, window_bounds = array<i64: 64, 1>}, {pipeline_mode = #tpu.pipeline_mode<synchronous>, transform_indices = @transform_7, window_bounds = array<i64: 2, 64>}, {pipeline_mode = #tpu.pipeline_mode<synchronous>, transform_indices = @transform_8, window_bounds = array<i64: 2, 1>}, {transform_indices = @transform_9, window_bounds = array<i64: 2, 256>}]} {
    %c0 = arith.constant 0 : index
    %c0_0 = arith.constant 0 : index
    %0 = vector.load %arg2[%c0, %c0_0] : memref<64x3xf32, #tpu.memory_space<vmem>>, vector<64x3xf32>
    %c0_1 = arith.constant 0 : index
    %c0_2 = arith.constant 0 : index
    %1 = vector.load %arg3[%c0_1, %c0_2] : memref<64x1xf32, #tpu.memory_space<vmem>>, vector<64x1xf32>
    %c0_3 = arith.constant 0 : index
    %c0_4 = arith.constant 0 : index
    %2 = vector.load %arg4[%c0_3, %c0_4] : memref<64x64xf32, #tpu.memory_space<vmem>>, vector<64x64xf32>
    %c0_5 = arith.constant 0 : index
    %c0_6 = arith.constant 0 : index
    %3 = vector.load %arg5[%c0_5, %c0_6] : memref<64x1xf32, #tpu.memory_space<vmem>>, vector<64x1xf32>
    %c0_7 = arith.constant 0 : index
    %c0_8 = arith.constant 0 : index
    %4 = vector.load %arg6[%c0_7, %c0_8] : memref<64x64xf32, #tpu.memory_space<vmem>>, vector<64x64xf32>
    %c0_9 = arith.constant 0 : index
    %c0_10 = arith.constant 0 : index
    %5 = vector.load %arg7[%c0_9, %c0_10] : memref<64x1xf32, #tpu.memory_space<vmem>>, vector<64x1xf32>
    %c0_11 = arith.constant 0 : index
    %c0_12 = arith.constant 0 : index
    %6 = vector.load %arg8[%c0_11, %c0_12] : memref<2x64xf32, #tpu.memory_space<vmem>>, vector<2x64xf32>
    %c0_13 = arith.constant 0 : index
    %c0_14 = arith.constant 0 : index
    %7 = vector.load %arg9[%c0_13, %c0_14] : memref<2x1xf32, #tpu.memory_space<vmem>>, vector<2x1xf32>
    %c0_i32 = arith.constant 0 : i32
    %c256_i32 = arith.constant 256 : i32
    %8 = arith.muli %c0_i32, %c256_i32 : i32
    %9 = tpu.assume_multiple %8, 256 : i32
    %c0_15 = arith.constant 0 : index
    %10 = arith.index_cast %9 : i32 to index
    %11 = vector.load %arg1[%c0_15, %10] : memref<3x256xf32, #tpu.memory_space<vmem>>, vector<3x256xf32>
    %cst = arith.constant dense<0.000000e+00> : vector<64x256xf32>
    %12 = tpu.matmul %0, %11, %cst {dimension_numbers = #tpu.dot_dimension_numbers<[1], [0], [0], [1], [0, 0, 1, 1], [], []>} : vector<64x3xf32>, vector<3x256xf32>, vector<64x256xf32> -> vector<64x256xf32>
    %13 = vector.broadcast %1 : vector<64x1xf32> to vector<64x256xf32>
    %14 = arith.addf %12, %13 : vector<64x256xf32>
    %cst_16 = arith.constant 0.000000e+00 : f32
    %15 = vector.broadcast %cst_16 : f32 to vector<64x256xf32>
    %16 = arith.cmpf ogt, %14, %15 : vector<64x256xf32>
    %cst_17 = arith.constant 0.000000e+00 : f32
    %17 = vector.broadcast %cst_17 : f32 to vector<64x256xf32>
    %18 = arith.minimumf %14, %17 : vector<64x256xf32>
    %19 = math.exp %18 : vector<64x256xf32>
    %cst_18 = arith.constant 1.000000e+00 : f32
    %20 = vector.broadcast %cst_18 : f32 to vector<64x256xf32>
    %21 = arith.subf %19, %20 : vector<64x256xf32>
    %22 = arith.select %16, %14, %21 : vector<64x256xi1>, vector<64x256xf32>
    %cst_19 = arith.constant dense<0.000000e+00> : vector<64x256xf32>
    %23 = tpu.matmul %2, %22, %cst_19 {dimension_numbers = #tpu.dot_dimension_numbers<[1], [0], [0], [1], [0, 0, 1, 1], [], []>} : vector<64x64xf32>, vector<64x256xf32>, vector<64x256xf32> -> vector<64x256xf32>
    %24 = vector.broadcast %3 : vector<64x1xf32> to vector<64x256xf32>
    %25 = arith.addf %23, %24 : vector<64x256xf32>
    %cst_20 = arith.constant 0.000000e+00 : f32
    %26 = vector.broadcast %cst_20 : f32 to vector<64x256xf32>
    %27 = arith.cmpf ogt, %25, %26 : vector<64x256xf32>
    %cst_21 = arith.constant 0.000000e+00 : f32
    %28 = vector.broadcast %cst_21 : f32 to vector<64x256xf32>
    %29 = arith.minimumf %25, %28 : vector<64x256xf32>
    %30 = math.exp %29 : vector<64x256xf32>
    %cst_22 = arith.constant 1.000000e+00 : f32
    %31 = vector.broadcast %cst_22 : f32 to vector<64x256xf32>
    %32 = arith.subf %30, %31 : vector<64x256xf32>
    %33 = arith.select %27, %25, %32 : vector<64x256xi1>, vector<64x256xf32>
    %cst_23 = arith.constant dense<0.000000e+00> : vector<64x256xf32>
    %34 = tpu.matmul %4, %33, %cst_23 {dimension_numbers = #tpu.dot_dimension_numbers<[1], [0], [0], [1], [0, 0, 1, 1], [], []>} : vector<64x64xf32>, vector<64x256xf32>, vector<64x256xf32> -> vector<64x256xf32>
    %35 = vector.broadcast %5 : vector<64x1xf32> to vector<64x256xf32>
    %36 = arith.addf %34, %35 : vector<64x256xf32>
    %cst_24 = arith.constant 0.000000e+00 : f32
    %37 = vector.broadcast %cst_24 : f32 to vector<64x256xf32>
    %38 = arith.cmpf ogt, %36, %37 : vector<64x256xf32>
    %cst_25 = arith.constant 0.000000e+00 : f32
    %39 = vector.broadcast %cst_25 : f32 to vector<64x256xf32>
    %40 = arith.minimumf %36, %39 : vector<64x256xf32>
    %41 = math.exp %40 : vector<64x256xf32>
    %cst_26 = arith.constant 1.000000e+00 : f32
    %42 = vector.broadcast %cst_26 : f32 to vector<64x256xf32>
    %43 = arith.subf %41, %42 : vector<64x256xf32>
    %44 = arith.select %38, %36, %43 : vector<64x256xi1>, vector<64x256xf32>
    %cst_27 = arith.constant dense<0.000000e+00> : vector<2x256xf32>
    %45 = tpu.matmul %6, %44, %cst_27 {dimension_numbers = #tpu.dot_dimension_numbers<[1], [0], [0], [1], [0, 0, 1, 1], [], []>} : vector<2x64xf32>, vector<64x256xf32>, vector<2x256xf32> -> vector<2x256xf32>
    %46 = vector.broadcast %7 : vector<2x1xf32> to vector<2x256xf32>
    %47 = arith.addf %45, %46 : vector<2x256xf32>
    %c0_28 = arith.constant 0 : index
    %48 = arith.index_cast %9 : i32 to index
    %49 = vector.load %arg10[%c0_28, %48] : memref<2x256xf32, #tpu.memory_space<vmem>>, vector<2x256xf32>
    tpu.vector_store %arg10[%c0_28, %48], %47 {strides = array<i32>} : memref<2x256xf32, #tpu.memory_space<vmem>>, vector<2x256xf32>,
    %c1_i32 = arith.constant 1 : i32
    return
  }
  func.func @transform_0(%arg0: i32) -> (i32, i32) {
    %c0_i32 = arith.constant 0 : i32
    %c0_i32_0 = arith.constant 0 : i32
    return %c0_i32, %arg0 : i32, i32
  }
  func.func @transform_1(%arg0: i32) -> (i32, i32) {
    %c0_i32 = arith.constant 0 : i32
    %c0_i32_0 = arith.constant 0 : i32
    %c0_i32_1 = arith.constant 0 : i32
    return %c0_i32, %c0_i32_0 : i32, i32
  }
  func.func @transform_2(%arg0: i32) -> (i32, i32) {
    %c0_i32 = arith.constant 0 : i32
    %c0_i32_0 = arith.constant 0 : i32
    %c0_i32_1 = arith.constant 0 : i32
    return %c0_i32, %c0_i32_0 : i32, i32
  }
  func.func @transform_3(%arg0: i32) -> (i32, i32) {
    %c0_i32 = arith.constant 0 : i32
    %c0_i32_0 = arith.constant 0 : i32
    %c0_i32_1 = arith.constant 0 : i32
    return %c0_i32, %c0_i32_0 : i32, i32
  }
  func.func @transform_4(%arg0: i32) -> (i32, i32) {
    %c0_i32 = arith.constant 0 : i32
    %c0_i32_0 = arith.constant 0 : i32
    %c0_i32_1 = arith.constant 0 : i32
    return %c0_i32, %c0_i32_0 : i32, i32
  }
  func.func @transform_5(%arg0: i32) -> (i32, i32) {
    %c0_i32 = arith.constant 0 : i32
    %c0_i32_0 = arith.constant 0 : i32
    %c0_i32_1 = arith.constant 0 : i32
    return %c0_i32, %c0_i32_0 : i32, i32
  }
  func.func @transform_6(%arg0: i32) -> (i32, i32) {
    %c0_i32 = arith.constant 0 : i32
    %c0_i32_0 = arith.constant 0 : i32
    %c0_i32_1 = arith.constant 0 : i32
    return %c0_i32, %c0_i32_0 : i32, i32
  }
  func.func @transform_7(%arg0: i32) -> (i32, i32) {
    %c0_i32 = arith.constant 0 : i32
    %c0_i32_0 = arith.constant 0 : i32
    %c0_i32_1 = arith.constant 0 : i32
    return %c0_i32, %c0_i32_0 : i32, i32
  }
  func.func @transform_8(%arg0: i32) -> (i32, i32) {
    %c0_i32 = arith.constant 0 : i32
    %c0_i32_0 = arith.constant 0 : i32
    %c0_i32_1 = arith.constant 0 : i32
    return %c0_i32, %c0_i32_0 : i32, i32
  }
  func.func @transform_9(%arg0: i32) -> (i32, i32) {
    %c0_i32 = arith.constant 0 : i32
    %c0_i32_0 = arith.constant 0 : i32
    return %c0_i32, %arg0 : i32, i32
  }
}

</mosaic_0001>

<bundles_post_ra>
// kernel: tpu_custom_call.1
= control target key start
LH: loop header
LB: loop body
LE: loop exit
PB: predicated region body
PF: predicated region fallthrough
CT: control target
= control target key end

     0   :  { %v1121_v3 = vmov 0   ;;  %vm153_vm0 = vcmask 1042432   ;;  %s1588_s0 = inlined_call_operand.vmem [shape: f32[3,256], index: 0, kind: input, shape index: {}]   ;;  %s1589_s1 = inlined_call_operand.vmem [shape: f32[64,3], index: 1, kind: input, shape index: {}]   ;;  %s1590_s2 = inlined_call_operand.vmem [shape: f32[64,1], index: 2, kind: input, shape index: {}]   ;;  %s1591_s3 = inlined_call_operand.vmem [shape: f32[64,64], index: 3, kind: input, shape index: {}]   ;;  %s1592_s4 = inlined_call_operand.vmem [shape: f32[64,1], index: 4, kind: input, shape index: {}]   ;;  %s1593_s5 = inlined_call_operand.vmem [shape: f32[64,64], index: 5, kind: input, shape index: {}]   ;;  %s1594_s6 = inlined_call_operand.vmem [shape: f32[64,1], index: 6, kind: input, shape index: {}]   ;;  %s1595_s7 = inlined_call_operand.vmem [shape: f32[2,64], index: 7, kind: input, shape index: {}]   ;;  %s1596_s8 = inlined_call_operand.vmem [shape: f32[2,1], index: 8, kind: input, shape index: {}]   ;;  %s1597_s9 = inlined_call_operand.hbm [shape: f32[2,256], index: 9, kind: output, shape index: {}]  }
   0x1   :  { %v48_v0 = vld [vmem:[%s1590_s2 + $0x38] sm:$0xff]  ;;  %v46_v1 = vld [vmem:[%s1590_s2 + $0x28] sm:$0xff]  ;;  %v83_v2 = vld [vmem:[%s1588_s0] sm:$0x77]  ;;  %997 = vset.pattern.permute.xlu1 %v1121_v3  ;;  %996 = vset.pattern.permute.xlu0 %v1121_v3 }
   0x2   :  { %125 = vst [vmem:[#allocation1] ss:$2 sm:$0xff] %v83_v2  ;;  %121 = vperm.xlu0 %996, %v48_v0   ;;  %111 = vperm.xlu1 %997, %v46_v1   ;;  %v44_v4 = vld [vmem:[%s1590_s2 + $0x18] sm:$0xff]  ;;  %v47_v5 = vld [vmem:[%s1590_s2 + $0x30] sm:$0xff]  ;;  %v45_v6 = vld [vmem:[%s1590_s2 + $0x20] sm:$0xff] }
   0x3   :  { %998 = vset.pattern.permute.xlu2 %v1121_v3 }
   0x4   :  { %101 = vperm.xlu2 %998, %v44_v4  }
   0x5   :  { %14 = vsyncpa [#allocation3], 0  ;;  %v33_v9 = vld [vmem:[%s1589_s1] sm:$0xff]  ;;  %vm128_vm1 = vcmask 23552   ;;  %v38_v10 = vld [vmem:[%s1589_s1 + $0x28] sm:$0xff]  ;;  %s1122_s10 = smov [#allocation2]  }
   0x6   :  { %v43_v11 = vld [vmem:[%s1590_s2 + $0x10] sm:$0xff]  ;;  %v42_v12 = vld [vmem:[%s1590_s2 + $0x8] sm:$0xff]  ;;  %v41_v13 = vld [vmem:[%s1590_s2] sm:$0xff]  ;;  %s881_s11 = sshll.u32 %s1122_s10, 4  ;;  %s883_s13 = sshll.u32 %s1597_s9, 4  ;;  %s882_s11 = int_to_ptr.vmem [resolvable:$true] %s881_s11  ;;  %s884_s13 = int_to_ptr.hbm [resolvable:$true] %s883_s13 }
   0x7   :  { %v34_v14 = vld [vmem:[%s1589_s1 + $0x8] sm:$0xff]  ;;  %v39_v15 = vld [vmem:[%s1589_s1 + $0x30] sm:$0xff]  ;;  %v64_v16 = vld [vmem:[%s1592_s4 + $0x38] sm:$0xff] }
   0x8   :  { %v63_v17 = vld [vmem:[%s1592_s4 + $0x30] sm:$0xff]  ;;  %v62_v18 = vld [vmem:[%s1592_s4 + $0x28] sm:$0xff]  ;;  %v40_v20 = vld [vmem:[%s1589_s1 + $0x38] sm:$0xff] }
   0x9   :  { %v126_v7 = vld.sshfl [vmem:[#allocation1] sm:$0xff pattern:$0x75316420]  ;;  %v127_v8 = vld.sshfl [vmem:[#allocation1 + $0x8] sm:$0xff pattern:$0x75316420] }
   0xa   :  { %892 = vmatpush.msk.msra.mxu0 %vm153_vm0, %v126_v7  ;;  %992 = vmatpush.msk.msra.mxu2 %vm153_vm0, %v126_v7  ;;  %v35_v19 = vld [vmem:[%s1589_s1 + $0x10] sm:$0xff]  ;;  %v61_v21 = vld [vmem:[%s1592_s4 + $0x20] sm:$0xff]  ;;  %v60_v22 = vld [vmem:[%s1592_s4 + $0x18] sm:$0xff] }
   0xb   :  { %901 = vmatpush.msk.msra.mxu1 %vm153_vm0, %v127_v8  ;;  %993 = vmatpush.msk.msra.mxu3 %vm153_vm0, %v127_v8  ;;  %v59_v23 = vld [vmem:[%s1592_s4 + $0x10] sm:$0xff]  ;;  %v36_v24 = vld [vmem:[%s1589_s1 + $0x18] sm:$0xff]  ;;  %v58_v25 = vld [vmem:[%s1592_s4 + $0x8] sm:$0xff] }
   0xc   :  { %116 = vperm.xlu0 %996, %v47_v5   ;;  %106 = vperm.xlu1 %997, %v45_v6   ;;  %v57_v26 = vld [vmem:[%s1592_s4] sm:$0xff]  ;;  %v80_v27 = vld [vmem:[%s1594_s6 + $0x38] sm:$0xff]  ;;  %v79_v29 = vld [vmem:[%s1594_s6 + $0x30] sm:$0xff] }
   0xd   :  { %893 = vmatmul.msk.f32.vlgmr.msra.gmra.mxu0 %vm128_vm1, %v33_v9  ;;  %898 = vmatmul.msk.f32.vlgmr.msra.gmra.mxu2 %vm128_vm1, %v38_v10  ;;  %v37_v28 = vld [vmem:[%s1589_s1 + $0x20] sm:$0xff]  ;;  %v78_v30 = vld [vmem:[%s1594_s6 + $0x28] sm:$0xff]  ;;  %v76_v32 = vld [vmem:[%s1594_s6 + $0x18] sm:$0xff] }
   0xe   :  { %902 = vmatmul.msk.f32.vlgmr.msra.gmra.mxu1 %vm128_vm1, %v33_v9  ;;  %907 = vmatmul.msk.f32.vlgmr.msra.gmra.mxu3 %vm128_vm1, %v38_v10  ;;  %v77_v31 = vld [vmem:[%s1594_s6 + $0x20] sm:$0xff]  ;;  %v75_v33 = vld [vmem:[%s1594_s6 + $0x10] sm:$0xff]  ;;  %v74_v34 = vld [vmem:[%s1594_s6 + $0x8] sm:$0xff] }
   0xf   :  { %96 = vperm.xlu2 %998, %v43_v11   ;;  %v73_v35 = vld [vmem:[%s1594_s6] sm:$0xff] }
  0x10   :  { %v82_v36 = vld [vmem:[%s1596_s8] sm:$0x3] }
  0x14   :  { %91 = vperm.xlu0 %996, %v42_v12   ;;  %86 = vperm.xlu1 %997, %v41_v13  }
  0x15   :  { %894 = vmatmul.msk.f32.gmra.mxu0 %vm128_vm1, %v34_v14  ;;  %899 = vmatmul.msk.f32.gmra.mxu2 %vm128_vm1, %v39_v15 }
  0x16   :  { %903 = vmatmul.msk.f32.gmra.mxu1 %vm128_vm1, %v34_v14  ;;  %908 = vmatmul.msk.f32.gmra.mxu3 %vm128_vm1, %v39_v15 }
  0x17   :  { %373 = vperm.xlu2 %998, %v64_v16  }
  0x1c   :  { %368 = vperm.xlu0 %996, %v63_v17   ;;  %363 = vperm.xlu1 %997, %v62_v18  }
  0x1d   :  { %895 = vmatmul.msk.f32.gmra.mxu0 %vm128_vm1, %v35_v19  ;;  %900 = vmatmul.msk.f32.gmra.mxu2 %vm128_vm1, %v40_v20 }
  0x1e   :  { %904 = vmatmul.msk.f32.gmra.mxu1 %vm128_vm1, %v35_v19  ;;  %909 = vmatmul.msk.f32.gmra.mxu3 %vm128_vm1, %v40_v20 }
  0x1f   :  { %358 = vperm.xlu2 %998, %v61_v21  }
  0x24   :  { %353 = vperm.xlu0 %996, %v60_v22   ;;  %348 = vperm.xlu1 %997, %v59_v23  }
  0x25   :  { %896 = vmatmul.msk.f32.gmra.mxu0 %vm128_vm1, %v36_v24 }
  0x26   :  { %905 = vmatmul.msk.f32.gmra.mxu1 %vm128_vm1, %v36_v24 }
  0x27   :  { %343 = vperm.xlu2 %998, %v58_v25  }
  0x2c   :  { %338 = vperm.xlu0 %996, %v57_v26   ;;  %616 = vperm.xlu1 %997, %v80_v27  }
  0x2d   :  { %897 = vmatmul.msk.f32.gmra.mxu0 %vm128_vm1, %v37_v28 }
  0x2e   :  { %906 = vmatmul.msk.f32.gmra.mxu1 %vm128_vm1, %v37_v28  ;;  %vm376_vm1 = vcmask 523264  }
  0x2f   :  { %611 = vperm.xlu2 %998, %v79_v29  }
  0x34   :  { %606 = vperm.xlu0 %996, %v78_v30   ;;  %601 = vperm.xlu1 %997, %v77_v31  }
  0x37   :  { %596 = vperm.xlu2 %998, %v76_v32  }
  0x3c   :  { %591 = vperm.xlu0 %996, %v75_v33   ;;  %586 = vperm.xlu1 %997, %v74_v34  }
  0x3f   :  { %581 = vperm.xlu2 %998, %v73_v35  }
  0x44   :  { %823 = vperm.xlu0 %996, %v82_v36  }
  0x5e   :  { %v102_v45 = vpop.permute.xlu2 %101 }
  0x69   :  { %v97_v60 = vpop.permute.xlu2 %96 }
  0x74   :  { %v112_v39 = vpop.permute.xlu1 %111  ;;  %v122_v40 = vpop.permute.xlu0 %121 }
  0x7e   :  { %v1291_v46 = vpop.permute.xlu1 %106  ;;  %v117_v48 = vpop.permute.xlu0 %116 }
  0x86   :  { %v87_v1 = vpop.permute.xlu1 %86  ;;  %v92_v6 = vpop.permute.xlu0 %91 }
  0x8a   :  { %v175_v37 = vpop.f32.mrf.mxu0 }
  0x8b   :  { %v216_v38 = vpop.f32.mrf.mxu1  ;;  %v1311_v7 = vadd.f32 %v175_v37, %v87_v1 }
  0x8c   :  { %v1325_v23 = vadd.f32 %v216_v38, %v87_v1 }
  0x8d   :  { %v256_v22 = vmin.f32 %v1311_v7, 0.0  ;;  %vm240_vm0 = vcmp.gt.f32.partialorder %v1311_v7, 0.0 }
  0x8e   :  { %v257_v35 = vmin.f32 %v1325_v23, 0.0 }
  0x8f   :  { %v272_v34 = vmul.f32 1.442695, %v256_v22 }
  0x90   :  { %v190_v41 = vpop.f32.mrf.mxu2 }
  0x91   :  { %v231_v42 = vpop.f32.mrf.mxu3  ;;  %v1293_v47 = vadd.f32 %v190_v41, %v112_v39 }
  0x92   :  { %v178_v43 = vpop.f32.mrf.mxu0  ;;  %v1295_v49 = vadd.f32 %v231_v42, %v112_v39 }
  0x93   :  { %v219_v44 = vpop.f32.mrf.mxu1  ;;  %v266_v55 = vmin.f32 %v1293_v47, 0.0  ;;  %v1313_v11 = vadd.f32 %v178_v43, %v92_v6  ;;  %vm250_vm6 = vcmp.gt.f32.partialorder %v1293_v47, 0.0 }
  0x94   :  { %v267_v57 = vmin.f32 %v1295_v49, 0.0  ;;  %v1321_v18 = vadd.f32 %v219_v44, %v92_v6  ;;  %vm251_vm7 = vcmp.gt.f32.partialorder %v1295_v49, 0.0 }
  0x95   :  { %v292_v61 = vmul.f32 1.442695, %v266_v55  ;;  %v258_v25 = vmin.f32 %v1313_v11, 0.0  ;;  %vm242_vm14 = vcmp.gt.f32.partialorder %v1313_v11, 0.0 }
  0x96   :  { %v294_v62 = vmul.f32 1.442695, %v267_v57  ;;  %v259_v29 = vmin.f32 %v1321_v18, 0.0  ;;  %vm243_vm15 = vcmp.gt.f32.partialorder %v1321_v18, 0.0 }
  0x97   :  { %999 = vpow2.f32 %v292_v61 }
  0x98   :  { %v193_v50 = vpop.f32.mrf.mxu2  ;;  %1001 = vpow2.f32 %v294_v62  ;;  %v278_v44 = vmul.f32 1.442695, %v259_v29 }
  0x99   :  { %v1297_v51 = vadd.f32 %v193_v50, %v117_v48  ;;  %v234_v52 = vpop.f32.mrf.mxu3 }
  0x9a   :  { %v1299_v53 = vadd.f32 %v234_v52, %v117_v48  ;;  %v181_v54 = vpop.f32.mrf.mxu0 }
  0x9b   :  { %v222_v56 = vpop.f32.mrf.mxu1  ;;  %v268_v58 = vmin.f32 %v1297_v51, 0.0  ;;  %v1305_v63 = vadd.f32 %v181_v54, %v97_v60  ;;  %vm252_vm4 = vcmp.gt.f32.partialorder %v1297_v51, 0.0 }
  0x9c   :  { %v269_v59 = vmin.f32 %v1299_v53, 0.0  ;;  %v1307_v3 = vadd.f32 %v222_v56, %v97_v60  ;;  %vm253_vm5 = vcmp.gt.f32.partialorder %v1299_v53, 0.0 }
  0x9d   :  { %v296_v2 = vmul.f32 1.442695, %v268_v58  ;;  %v260_v15 = vmin.f32 %v1305_v63, 0.0  ;;  %v1000_v28 = vpop.eup %999  ;;  %vm244_vm12 = vcmp.gt.f32.partialorder %v1305_v63, 0.0 }
  0x9e   :  { %v298_v8 = vmul.f32 1.442695, %v269_v59  ;;  %v261_v19 = vmin.f32 %v1307_v3, 0.0  ;;  %v1002_v31 = vpop.eup %1001  ;;  %v920_v48 = vadd.f32 -1.0, %v1000_v28  ;;  %vm245_vm13 = vcmp.gt.f32.partialorder %v1307_v3, 0.0 }
  0x9f   :  { %1003 = vpow2.f32 %v296_v2  ;;  %v280_v26 = vmul.f32 1.442695, %v260_v15  ;;  %v921_v61 = vadd.f32 -1.0, %v1002_v31 }
  0xa0   :  { %v196_v0 = vpop.f32.mrf.mxu2  ;;  %1005 = vpow2.f32 %v298_v8  ;;  %v282_v30 = vmul.f32 1.442695, %v261_v19 }
  0xa1   :  { %v1309_v4 = vadd.f32 %v196_v0, %v122_v40  ;;  %v237_v5 = vpop.f32.mrf.mxu3  ;;  %v274_v0 = vmul.f32 1.442695, %v257_v35  ;;  %v55_v35 = vld [vmem:[%s1591_s3 + $0x30] sm:$0xff] }
  0xa2   :  { %v238_v9 = vadd.f32 %v237_v5, %v122_v40  ;;  %v184_v10 = vpop.f32.mrf.mxu0  ;;  %v276_v40 = vmul.f32 1.442695, %v258_v25  ;;  %v330_v5 = vsel %vm250_vm6, %v1293_v47, %v920_v48 }
  0xa3   :  { %v270_v12 = vmin.f32 %v1309_v4, 0.0  ;;  %v1316_v13 = vadd.f32 %v184_v10, %v102_v45  ;;  %v225_v14 = vpop.f32.mrf.mxu1  ;;  %vm254_vm2 = vcmp.gt.f32.partialorder %v1309_v4, 0.0 }
  0xa4   :  { %v271_v16 = vmin.f32 %v238_v9, 0.0  ;;  %v1319_v17 = vadd.f32 %v225_v14, %v102_v45  ;;  %vm255_vm3 = vcmp.gt.f32.partialorder %v238_v9, 0.0 }
  0xa5   :  { %v300_v20 = vmul.f32 1.442695, %v270_v12  ;;  %v262_v24 = vmin.f32 %v1316_v13, 0.0  ;;  %v1004_v33 = vpop.eup %1003  ;;  %vm246_vm10 = vcmp.gt.f32.partialorder %v1316_v13, 0.0 }
  0xa6   :  { %v302_v21 = vmul.f32 1.442695, %v271_v16  ;;  %v263_v27 = vmin.f32 %v1319_v17, 0.0  ;;  %v1006_v39 = vpop.eup %1005  ;;  %v922_v55 = vadd.f32 -1.0, %v1004_v33  ;;  %vm247_vm11 = vcmp.gt.f32.partialorder %v1319_v17, 0.0  ;;  %v53_v33 = vld [vmem:[%s1591_s3 + $0x20] sm:$0xff] }
  0xa7   :  { %1007 = vpow2.f32 %v300_v20  ;;  %v284_v36 = vmul.f32 1.442695, %v262_v24  ;;  %v923_v58 = vadd.f32 -1.0, %v1006_v39 }
  0xa8   :  { %1009 = vpow2.f32 %v302_v21  ;;  %v286_v41 = vmul.f32 1.442695, %v263_v27  ;;  %v332_v1 = vsel %vm252_vm4, %v1297_v51, %v922_v55  ;;  %v331_v51 = vsel %vm251_vm7, %v1295_v49, %v921_v61 }
  0xa9   :  { %1011 = vpow2.f32 %v280_v26 }
  0xaa   :  { %v187_v32 = vpop.f32.mrf.mxu0  ;;  %1013 = vpow2.f32 %v282_v30 }
  0xab   :  { %v188_v37 = vadd.f32 %v187_v32, %v1291_v46  ;;  %v228_v38 = vpop.f32.mrf.mxu1  ;;  %1015 = vpow2.f32 %v284_v36  ;;  %v56_v36 = vld [vmem:[%s1591_s3 + $0x38] sm:$0xff] }
  0xac   :  { %v229_v42 = vadd.f32 %v228_v38, %v1291_v46  ;;  %1017 = vpow2.f32 %v286_v41 }
  0xad   :  { %v1008_v43 = vpop.eup %1007  ;;  %v264_v45 = vmin.f32 %v188_v37, 0.0  ;;  %vm248_vm8 = vcmp.gt.f32.partialorder %v188_v37, 0.0 }
  0xae   :  { %v1010_v50 = vpop.eup %1009  ;;  %v265_v52 = vmin.f32 %v229_v42, 0.0  ;;  %v924_v54 = vadd.f32 -1.0, %v1008_v43  ;;  %vm249_vm9 = vcmp.gt.f32.partialorder %v229_v42, 0.0 }
  0xaf   :  { %v288_v56 = vmul.f32 1.442695, %v264_v45  ;;  %v925_v57 = vadd.f32 -1.0, %v1010_v50  ;;  %v1012_v62 = vpop.eup %1011  ;;  %v369_v50 = vpop.permute.xlu0 %368 }
  0xb0   :  { %v290_v59 = vmul.f32 1.442695, %v265_v52  ;;  %v334_v60 = vsel %vm254_vm2, %v1309_v4, %v924_v54  ;;  %v1014_v2 = vpop.eup %1013  ;;  %v333_v4 = vsel %vm253_vm5, %v1299_v53, %v923_v58  ;;  %v914_v20 = vadd.f32 -1.0, %v1012_v62  ;;  %v374_v52 = vpop.permute.xlu2 %373 }
  0xb1   :  { %1019 = vpow2.f32 %v288_v56  ;;  %409 = vmatpush.msrb.mxu2 %v334_v60  ;;  %v335_v46 = vsel %vm255_vm3, %v238_v9, %v925_v57  ;;  %v1016_v6 = vpop.eup %1015  ;;  %v915_v49 = vadd.f32 -1.0, %v1014_v2  ;;  %vm241_vm2 = vcmp.gt.f32.partialorder %v1325_v23, 0.0  ;;  %v364_v57 = vpop.permute.xlu1 %363 }
  0xb2   :  { %1021 = vpow2.f32 %v290_v59  ;;  %450 = vmatpush.msrb.mxu3 %v335_v46  ;;  %v1018_v8 = vpop.eup %1017  ;;  %v916_v53 = vadd.f32 -1.0, %v1016_v6  ;;  %v324_v29 = vsel %vm244_vm12, %v1305_v63, %v914_v20  ;;  %v49_v63 = vld [vmem:[%s1591_s3] sm:$0xff] }
  0xb3   :  { %1023 = vpow2.f32 %v276_v40  ;;  %410 = vmatpush.msrb.mxu2 %v332_v1  ;;  %v917_v16 = vadd.f32 -1.0, %v1018_v8  ;;  %v325_v31 = vsel %vm245_vm13, %v1307_v3, %v915_v49 }
  0xb4   :  { %1025 = vpow2.f32 %v278_v44  ;;  %451 = vmatpush.msrb.mxu3 %v333_v4  ;;  %v326_v25 = vsel %vm246_vm10, %v1316_v13, %v916_v53 }
  0xb5   :  { %1027 = vpow2.f32 %v272_v34  ;;  %411 = vmatpush.msrb.mxu2 %v330_v5  ;;  %v327_v27 = vsel %vm247_vm11, %v1319_v17, %v917_v16  ;;  %v54_v34 = vld [vmem:[%s1591_s3 + $0x28] sm:$0xff] }
  0xb6   :  { %1029 = vpow2.f32 %v274_v0  ;;  %452 = vmatpush.msrb.mxu3 %v331_v51 }
  0xb7   :  { %v1020_v9 = vpop.eup %1019  ;;  %v354_v56 = vpop.permute.xlu0 %353 }
  0xb8   :  { %v1022_v10 = vpop.eup %1021  ;;  %v918_v12 = vadd.f32 -1.0, %v1020_v9  ;;  %v359_v59 = vpop.permute.xlu2 %358 }
  0xb9   :  { %v1024_v14 = vpop.eup %1023  ;;  %v919_v15 = vadd.f32 -1.0, %v1022_v10 }
  0xba   :  { %v1026_v19 = vpop.eup %1025  ;;  %v328_v47 = vsel %vm248_vm8, %v188_v37, %v918_v12  ;;  %v912_v26 = vadd.f32 -1.0, %v1024_v14  ;;  %v349_v12 = vpop.permute.xlu1 %348 }
  0xbb   :  { %v1028_v21 = vpop.eup %1027  ;;  %412 = vmatpush.msrb.mxu2 %v328_v47  ;;  %v329_v22 = vsel %vm249_vm9, %v229_v42, %v919_v15  ;;  %v913_v28 = vadd.f32 -1.0, %v1026_v19 }
  0xbc   :  { %v1030_v24 = vpop.eup %1029  ;;  %453 = vmatpush.msrb.mxu3 %v329_v22  ;;  %v910_v30 = vadd.f32 -1.0, %v1028_v21  ;;  %v322_v32 = vsel %vm242_vm14, %v1313_v11, %v912_v26 }
  0xbd   :  { %413 = vmatpush.msrb.mxu2 %v326_v25  ;;  %v911_v13 = vadd.f32 -1.0, %v1030_v24  ;;  %v323_v17 = vsel %vm243_vm15, %v1321_v18, %v913_v28  ;;  %v50_v18 = vld [vmem:[%s1591_s3 + $0x8] sm:$0xff] }
  0xbe   :  { %454 = vmatpush.msrb.mxu3 %v327_v27  ;;  %v320_v3 = vsel %vm240_vm0, %v1311_v7, %v910_v30  ;;  %v51_v7 = vld [vmem:[%s1591_s3 + $0x10] sm:$0xff] }
  0xbf   :  { %414 = vmatpush.msrb.mxu2 %v324_v29  ;;  %v321_v11 = vsel %vm241_vm2, %v1325_v23, %v911_v13  ;;  %v52_v23 = vld [vmem:[%s1591_s3 + $0x18] sm:$0xff]  ;;  %v339_v8 = vpop.permute.xlu0 %338 }
  0xc0   :  { %455 = vmatpush.msrb.mxu3 %v325_v31  ;;  %v344_v24 = vpop.permute.xlu2 %343 }
  0xc1   :  { %415 = vmatpush.msrb.mxu2 %v322_v32 }
  0xc2   :  { %456 = vmatpush.msrb.mxu3 %v323_v17 }
  0xc3   :  { %416 = vmatpush.msrb.mxu2 %v320_v3 }
  0xc4   :  { %457 = vmatpush.msrb.mxu3 %v321_v11  ;;  %926 = vmatmul.msk.f32.vlgmr.msrb.gmra.mxu2 %vm376_vm1, %v49_v63 }
  0xc5   :  { %934 = vmatmul.msk.f32.vlgmr.msrb.gmra.mxu3 %vm376_vm1, %v49_v63 }
  0xcc   :  { %927 = vmatmul.msk.f32.gmra.mxu2 %vm376_vm1, %v50_v18 }
  0xcd   :  { %935 = vmatmul.msk.f32.gmra.mxu3 %vm376_vm1, %v50_v18 }
  0xd4   :  { %928 = vmatmul.msk.f32.gmra.mxu2 %vm376_vm1, %v51_v7 }
  0xd5   :  { %936 = vmatmul.msk.f32.gmra.mxu3 %vm376_vm1, %v51_v7 }
  0xdc   :  { %929 = vmatmul.msk.f32.gmra.mxu2 %vm376_vm1, %v52_v23 }
  0xdd   :  { %937 = vmatmul.msk.f32.gmra.mxu3 %vm376_vm1, %v52_v23 }
  0xe4   :  { %930 = vmatmul.msk.f32.gmra.mxu2 %vm376_vm1, %v53_v33 }
  0xe5   :  { %938 = vmatmul.msk.f32.gmra.mxu3 %vm376_vm1, %v53_v33 }
  0xec   :  { %931 = vmatmul.msk.f32.gmra.mxu2 %vm376_vm1, %v54_v34 }
  0xed   :  { %939 = vmatmul.msk.f32.gmra.mxu3 %vm376_vm1, %v54_v34 }
  0xf4   :  { %932 = vmatmul.msk.f32.gmra.mxu2 %vm376_vm1, %v55_v35 }
  0xf5   :  { %940 = vmatmul.msk.f32.gmra.mxu3 %vm376_vm1, %v55_v35 }
  0xfc   :  { %933 = vmatmul.msk.f32.gmra.mxu2 %vm376_vm1, %v56_v36 }
  0xfd   :  { %941 = vmatmul.msk.f32.gmra.mxu3 %vm376_vm1, %v56_v36 }
 0x147   :  { %v418_v37 = vpop.f32.mrf.mxu2 }
 0x148   :  { %v459_v38 = vpop.f32.mrf.mxu3  ;;  %v1418_v53 = vadd.f32 %v418_v37, %v339_v8 }
 0x149   :  { %v1420_v14 = vadd.f32 %v459_v38, %v339_v8 }
 0x14a   :  { %v499_v38 = vmin.f32 %v1418_v53, 0.0  ;;  %vm483_vm2 = vcmp.gt.f32.partialorder %v1418_v53, 0.0 }
 0x14f   :  { %v421_v39 = vpop.f32.mrf.mxu2 }
 0x150   :  { %v462_v40 = vpop.f32.mrf.mxu3  ;;  %v1430_v29 = vadd.f32 %v421_v39, %v344_v24 }
 0x151   :  { %v1433_v13 = vadd.f32 %v462_v40, %v344_v24 }
 0x152   :  { %v501_v33 = vmin.f32 %v1430_v29, 0.0  ;;  %vm485_vm15 = vcmp.gt.f32.partialorder %v1430_v29, 0.0 }
 0x153   :  { %v502_v35 = vmin.f32 %v1433_v13, 0.0  ;;  %vm486_vm0 = vcmp.gt.f32.partialorder %v1433_v13, 0.0 }
 0x157   :  { %v424_v41 = vpop.f32.mrf.mxu2 }
 0x158   :  { %v465_v42 = vpop.f32.mrf.mxu3  ;;  %v1424_v47 = vadd.f32 %v424_v41, %v349_v12  ;;  %v500_v41 = vmin.f32 %v1420_v14, 0.0 }
 0x159   :  { %v1427_v25 = vadd.f32 %v465_v42, %v349_v12 }
 0x15a   :  { %v503_v63 = vmin.f32 %v1424_v47, 0.0  ;;  %vm487_vm13 = vcmp.gt.f32.partialorder %v1424_v47, 0.0 }
 0x15b   :  { %v504_v18 = vmin.f32 %v1427_v25, 0.0  ;;  %vm488_vm14 = vcmp.gt.f32.partialorder %v1427_v25, 0.0 }
 0x15c   :  { %v523_v39 = vmul.f32 1.442695, %v503_v63 }
 0x15d   :  { %v525_v42 = vmul.f32 1.442695, %v504_v18 }
 0x15f   :  { %v427_v43 = vpop.f32.mrf.mxu2 }
 0x160   :  { %v468_v44 = vpop.f32.mrf.mxu3  ;;  %v1416_v9 = vadd.f32 %v427_v43, %v354_v56 }
 0x161   :  { %v1422_v15 = vadd.f32 %v468_v44, %v354_v56  ;;  %v519_v44 = vmul.f32 1.442695, %v501_v33 }
 0x162   :  { %v505_v30 = vmin.f32 %v1416_v9, 0.0  ;;  %vm489_vm11 = vcmp.gt.f32.partialorder %v1416_v9, 0.0 }
 0x163   :  { %v506_v32 = vmin.f32 %v1422_v15, 0.0  ;;  %vm490_vm12 = vcmp.gt.f32.partialorder %v1422_v15, 0.0 }
 0x164   :  { %v527_v34 = vmul.f32 1.442695, %v505_v30 }
 0x165   :  { %v529_v36 = vmul.f32 1.442695, %v506_v32 }
 0x167   :  { %v430_v45 = vpop.f32.mrf.mxu2 }
 0x168   :  { %v471_v48 = vpop.f32.mrf.mxu3  ;;  %v1410_v4 = vadd.f32 %v430_v45, %v359_v59 }
 0x169   :  { %v1413_v6 = vadd.f32 %v471_v48, %v359_v59  ;;  %v521_v48 = vmul.f32 1.442695, %v502_v35  ;;  %v71_v35 = vld [vmem:[%s1593_s5 + $0x30] sm:$0xff] }
 0x16a   :  { %v507_v20 = vmin.f32 %v1410_v4, 0.0  ;;  %vm491_vm9 = vcmp.gt.f32.partialorder %v1410_v4, 0.0 }
 0x16b   :  { %v508_v26 = vmin.f32 %v1413_v6, 0.0  ;;  %vm492_vm10 = vcmp.gt.f32.partialorder %v1413_v6, 0.0 }
 0x16c   :  { %v531_v3 = vmul.f32 1.442695, %v507_v20 }
 0x16d   :  { %v533_v7 = vmul.f32 1.442695, %v508_v26 }
 0x16f   :  { %v433_v54 = vpop.f32.mrf.mxu2 }
 0x170   :  { %v474_v55 = vpop.f32.mrf.mxu3  ;;  %v1400_v58 = vadd.f32 %v433_v54, %v364_v57 }
 0x171   :  { %v1402_v60 = vadd.f32 %v474_v55, %v364_v57  ;;  %v517_v55 = vmul.f32 1.442695, %v500_v41 }
 0x172   :  { %v509_v1 = vmin.f32 %v1400_v58, 0.0  ;;  %vm493_vm7 = vcmp.gt.f32.partialorder %v1400_v58, 0.0 }
 0x173   :  { %v510_v2 = vmin.f32 %v1402_v60, 0.0  ;;  %vm494_vm8 = vcmp.gt.f32.partialorder %v1402_v60, 0.0 }
 0x174   :  { %v535_v10 = vmul.f32 1.442695, %v509_v1 }
 0x175   :  { %v537_v16 = vmul.f32 1.442695, %v510_v2 }
 0x176   :  { %1031 = vpow2.f32 %v535_v10 }
 0x177   :  { %v436_v46 = vpop.f32.mrf.mxu2  ;;  %1033 = vpow2.f32 %v537_v16 }
 0x178   :  { %v1404_v61 = vadd.f32 %v436_v46, %v369_v50  ;;  %v477_v62 = vpop.f32.mrf.mxu3 }
 0x179   :  { %v1406_v0 = vadd.f32 %v477_v62, %v369_v50 }
 0x17a   :  { %v511_v5 = vmin.f32 %v1404_v61, 0.0  ;;  %vm495_vm5 = vcmp.gt.f32.partialorder %v1404_v61, 0.0 }
 0x17b   :  { %v512_v51 = vmin.f32 %v1406_v0, 0.0  ;;  %vm496_vm6 = vcmp.gt.f32.partialorder %v1406_v0, 0.0 }
 0x17c   :  { %v539_v21 = vmul.f32 1.442695, %v511_v5  ;;  %v1032_v37 = vpop.eup %1031 }
 0x17d   :  { %v541_v27 = vmul.f32 1.442695, %v512_v51  ;;  %v1034_v40 = vpop.eup %1033  ;;  %v952_v5 = vadd.f32 -1.0, %v1032_v37 }
 0x17e   :  { %1035 = vpow2.f32 %v539_v21  ;;  %v953_v10 = vadd.f32 -1.0, %v1034_v40 }
 0x17f   :  { %v439_v19 = vpop.f32.mrf.mxu2  ;;  %1037 = vpow2.f32 %v541_v27  ;;  %v573_v24 = vsel %vm493_vm7, %v1400_v58, %v952_v5 }
 0x180   :  { %v440_v22 = vadd.f32 %v439_v19, %v374_v52  ;;  %v480_v49 = vpop.f32.mrf.mxu3 }
 0x181   :  { %v481_v28 = vadd.f32 %v480_v49, %v374_v52  ;;  %v515_v52 = vmul.f32 1.442695, %v499_v38 }
 0x182   :  { %v513_v31 = vmin.f32 %v440_v22, 0.0  ;;  %vm497_vm3 = vcmp.gt.f32.partialorder %v440_v22, 0.0 }
 0x183   :  { %v514_v17 = vmin.f32 %v481_v28, 0.0  ;;  %vm498_vm4 = vcmp.gt.f32.partialorder %v481_v28, 0.0 }
 0x184   :  { %v543_v11 = vmul.f32 1.442695, %v513_v31  ;;  %v1036_v43 = vpop.eup %1035 }
 0x185   :  { %v545_v23 = vmul.f32 1.442695, %v514_v17  ;;  %v1038_v45 = vpop.eup %1037  ;;  %v954_v57 = vadd.f32 -1.0, %v1036_v43 }
 0x186   :  { %1039 = vpow2.f32 %v543_v11  ;;  %v955_v62 = vadd.f32 -1.0, %v1038_v45 }
 0x187   :  { %1041 = vpow2.f32 %v545_v23  ;;  %v575_v16 = vsel %vm495_vm5, %v1404_v61, %v954_v57  ;;  %v574_v61 = vsel %vm494_vm8, %v1402_v60, %v953_v10  ;;  %v607_v57 = vpop.permute.xlu0 %606 }
 0x188   :  { %1043 = vpow2.f32 %v531_v3  ;;  %v576_v21 = vsel %vm496_vm6, %v1406_v0, %v955_v62 }
 0x189   :  { %1045 = vpow2.f32 %v533_v7 }
 0x18a   :  { %1047 = vpow2.f32 %v527_v34  ;;  %v70_v34 = vld [vmem:[%s1593_s5 + $0x28] sm:$0xff] }
 0x18b   :  { %1049 = vpow2.f32 %v529_v36  ;;  %v72_v36 = vld [vmem:[%s1593_s5 + $0x38] sm:$0xff] }
 0x18c   :  { %v1040_v50 = vpop.eup %1039  ;;  %1051 = vpow2.f32 %v523_v39 }
 0x18d   :  { %v1042_v54 = vpop.eup %1041  ;;  %1053 = vpow2.f32 %v525_v42  ;;  %v956_v56 = vadd.f32 -1.0, %v1040_v50  ;;  %v612_v50 = vpop.permute.xlu2 %611 }
 0x18e   :  { %v1044_v59 = vpop.eup %1043  ;;  %1055 = vpow2.f32 %v519_v44  ;;  %v957_v46 = vadd.f32 -1.0, %v1042_v54 }
 0x18f   :  { %v1046_v1 = vpop.eup %1045  ;;  %1057 = vpow2.f32 %v521_v48  ;;  %v577_v2 = vsel %vm497_vm3, %v440_v22, %v956_v56  ;;  %v950_v19 = vadd.f32 -1.0, %v1044_v59  ;;  %vm484_vm3 = vcmp.gt.f32.partialorder %v1420_v14, 0.0 }
 0x190   :  { %v1048_v51 = vpop.eup %1047  ;;  %1059 = vpow2.f32 %v515_v52  ;;  %651 = vmatpush.msrb.mxu0 %v577_v2  ;;  %v578_v8 = vsel %vm498_vm4, %v481_v28, %v957_v46  ;;  %v951_v22 = vadd.f32 -1.0, %v1046_v1  ;;  %v617_v52 = vpop.permute.xlu1 %616 }
 0x191   :  { %v1050_v12 = vpop.eup %1049  ;;  %1061 = vpow2.f32 %v517_v55  ;;  %692 = vmatpush.msrb.mxu1 %v578_v8  ;;  %v948_v26 = vadd.f32 -1.0, %v1048_v51  ;;  %v571_v0 = vsel %vm491_vm9, %v1410_v4, %v950_v19 }
 0x192   :  { %v1052_v20 = vpop.eup %1051  ;;  %652 = vmatpush.msrb.mxu0 %v575_v16  ;;  %v949_v28 = vadd.f32 -1.0, %v1050_v12  ;;  %v572_v58 = vsel %vm492_vm10, %v1413_v6, %v951_v22 }
 0x193   :  { %v1054_v49 = vpop.eup %1053  ;;  %693 = vmatpush.msrb.mxu1 %v576_v21  ;;  %v946_v31 = vadd.f32 -1.0, %v1052_v20  ;;  %v569_v60 = vsel %vm489_vm11, %v1416_v9, %v948_v26 }
 0x194   :  { %v1056_v27 = vpop.eup %1055  ;;  %653 = vmatpush.msrb.mxu0 %v573_v24  ;;  %v947_v17 = vadd.f32 -1.0, %v1054_v49  ;;  %v570_v4 = vsel %vm490_vm12, %v1422_v15, %v949_v28  ;;  %v592_v24 = vpop.permute.xlu0 %591 }
 0x195   :  { %v1058_v30 = vpop.eup %1057  ;;  %694 = vmatpush.msrb.mxu1 %v574_v61  ;;  %v944_v3 = vadd.f32 -1.0, %v1056_v27  ;;  %v567_v18 = vsel %vm487_vm13, %v1424_v47, %v946_v31  ;;  %v65_v47 = vld [vmem:[%s1593_s5] sm:$0xff]  ;;  %v597_v56 = vpop.permute.xlu2 %596 }
 0x196   :  { %v1060_v32 = vpop.eup %1059  ;;  %654 = vmatpush.msrb.mxu0 %v571_v0  ;;  %v945_v11 = vadd.f32 -1.0, %v1058_v30  ;;  %v568_v7 = vsel %vm488_vm14, %v1427_v25, %v947_v17 }
 0x197   :  { %v1062_v63 = vpop.eup %1061  ;;  %695 = vmatpush.msrb.mxu1 %v572_v58  ;;  %v942_v6 = vadd.f32 -1.0, %v1060_v32  ;;  %v565_v23 = vsel %vm485_vm15, %v1430_v29, %v944_v3  ;;  %v66_v29 = vld [vmem:[%s1593_s5 + $0x8] sm:$0xff] }
 0x198   :  { %655 = vmatpush.msrb.mxu0 %v569_v60  ;;  %v943_v9 = vadd.f32 -1.0, %v1062_v63  ;;  %v566_v15 = vsel %vm486_vm0, %v1433_v13, %v945_v11  ;;  %v69_v13 = vld [vmem:[%s1593_s5 + $0x20] sm:$0xff]  ;;  %v602_v46 = vpop.permute.xlu1 %601 }
 0x199   :  { %696 = vmatpush.msrb.mxu1 %v570_v4  ;;  %v563_v25 = vsel %vm483_vm2, %v1418_v53, %v942_v6  ;;  %v67_v53 = vld [vmem:[%s1593_s5 + $0x10] sm:$0xff] }
 0x19a   :  { %656 = vmatpush.msrb.mxu0 %v567_v18  ;;  %v564_v33 = vsel %vm484_vm3, %v1420_v14, %v943_v9  ;;  %v68_v14 = vld [vmem:[%s1593_s5 + $0x18] sm:$0xff] }
 0x19b   :  { %697 = vmatpush.msrb.mxu1 %v568_v7 }
 0x19c   :  { %657 = vmatpush.msrb.mxu0 %v565_v23 }
 0x19d   :  { %698 = vmatpush.msrb.mxu1 %v566_v15  ;;  %v582_v21 = vpop.permute.xlu2 %581 }
 0x19e   :  { %658 = vmatpush.msrb.mxu0 %v563_v25 }
 0x19f   :  { %699 = vmatpush.msrb.mxu1 %v564_v33  ;;  %958 = vmatmul.msk.f32.vlgmr.msrb.gmra.mxu0 %vm376_vm1, %v65_v47 }
 0x1a0   :  { %966 = vmatmul.msk.f32.vlgmr.msrb.gmra.mxu1 %vm376_vm1, %v65_v47  ;;  %v587_v63 = vpop.permute.xlu1 %586 }
 0x1a7   :  { %959 = vmatmul.msk.f32.gmra.mxu0 %vm376_vm1, %v66_v29 }
 0x1a8   :  { %967 = vmatmul.msk.f32.gmra.mxu1 %vm376_vm1, %v66_v29 }
 0x1af   :  { %960 = vmatmul.msk.f32.gmra.mxu0 %vm376_vm1, %v67_v53 }
 0x1b0   :  { %968 = vmatmul.msk.f32.gmra.mxu1 %vm376_vm1, %v67_v53 }
 0x1b7   :  { %961 = vmatmul.msk.f32.gmra.mxu0 %vm376_vm1, %v68_v14 }
 0x1b8   :  { %969 = vmatmul.msk.f32.gmra.mxu1 %vm376_vm1, %v68_v14 }
 0x1bf   :  { %962 = vmatmul.msk.f32.gmra.mxu0 %vm376_vm1, %v69_v13 }
 0x1c0   :  { %970 = vmatmul.msk.f32.gmra.mxu1 %vm376_vm1, %v69_v13 }
 0x1c7   :  { %963 = vmatmul.msk.f32.gmra.mxu0 %vm376_vm1, %v70_v34 }
 0x1c8   :  { %971 = vmatmul.msk.f32.gmra.mxu1 %vm376_vm1, %v70_v34 }
 0x1cf   :  { %964 = vmatmul.msk.f32.gmra.mxu0 %vm376_vm1, %v71_v35 }
 0x1d0   :  { %972 = vmatmul.msk.f32.gmra.mxu1 %vm376_vm1, %v71_v35 }
 0x1d7   :  { %965 = vmatmul.msk.f32.gmra.mxu0 %vm376_vm1, %v72_v36 }
 0x1d8   :  { %973 = vmatmul.msk.f32.gmra.mxu1 %vm376_vm1, %v72_v36 }
 0x21c   :  { %v660_v37 = vpop.f32.mrf.mxu0 }
 0x21d   :  { %v701_v38 = vpop.f32.mrf.mxu1  ;;  %v1528_v26 = vadd.f32 %v660_v37, %v582_v21 }
 0x21e   :  { %v1530_v27 = vadd.f32 %v701_v38, %v582_v21 }
 0x21f   :  { %v741_v38 = vmin.f32 %v1528_v26, 0.0  ;;  %vm725_vm3 = vcmp.gt.f32.partialorder %v1528_v26, 0.0 }
 0x224   :  { %v663_v39 = vpop.f32.mrf.mxu0 }
 0x225   :  { %v704_v40 = vpop.f32.mrf.mxu1  ;;  %v1540_v18 = vadd.f32 %v663_v39, %v587_v63 }
 0x226   :  { %v1543_v9 = vadd.f32 %v704_v40, %v587_v63 }
 0x227   :  { %v743_v13 = vmin.f32 %v1540_v18, 0.0  ;;  %vm727_vm0 = vcmp.gt.f32.partialorder %v1540_v18, 0.0 }
 0x228   :  { %v744_v35 = vmin.f32 %v1543_v9, 0.0  ;;  %vm728_vm2 = vcmp.gt.f32.partialorder %v1543_v9, 0.0 }
 0x22c   :  { %v666_v41 = vpop.f32.mrf.mxu0 }
 0x22d   :  { %v707_v42 = vpop.f32.mrf.mxu1  ;;  %v1534_v0 = vadd.f32 %v666_v41, %v592_v24  ;;  %v742_v41 = vmin.f32 %v1530_v27, 0.0 }
 0x22e   :  { %v1537_v60 = vadd.f32 %v707_v42, %v592_v24 }
 0x22f   :  { %v745_v47 = vmin.f32 %v1534_v0, 0.0  ;;  %vm729_vm14 = vcmp.gt.f32.partialorder %v1534_v0, 0.0 }
 0x230   :  { %v746_v29 = vmin.f32 %v1537_v60, 0.0  ;;  %vm730_vm15 = vcmp.gt.f32.partialorder %v1537_v60, 0.0 }
 0x231   :  { %v765_v39 = vmul.f32 1.442695, %v745_v47 }
 0x232   :  { %v767_v42 = vmul.f32 1.442695, %v746_v29 }
 0x234   :  { %v669_v43 = vpop.f32.mrf.mxu0 }
 0x235   :  { %v710_v44 = vpop.f32.mrf.mxu1  ;;  %v1526_v22 = vadd.f32 %v669_v43, %v597_v56 }
 0x236   :  { %v1532_v61 = vadd.f32 %v710_v44, %v597_v56  ;;  %v761_v44 = vmul.f32 1.442695, %v743_v13 }
 0x237   :  { %v747_v6 = vmin.f32 %v1526_v22, 0.0  ;;  %vm731_vm12 = vcmp.gt.f32.partialorder %v1526_v22, 0.0 }
 0x238   :  { %v748_v23 = vmin.f32 %v1532_v61, 0.0  ;;  %vm732_vm13 = vcmp.gt.f32.partialorder %v1532_v61, 0.0 }
 0x239   :  { %v769_v34 = vmul.f32 1.442695, %v747_v6 }
 0x23a   :  { %v771_v36 = vmul.f32 1.442695, %v748_v23 }
 0x23c   :  { %v672_v45 = vpop.f32.mrf.mxu0 }
 0x23d   :  { %v713_v48 = vpop.f32.mrf.mxu1  ;;  %v1520_v12 = vadd.f32 %v672_v45, %v602_v46 }
 0x23e   :  { %v1523_v19 = vadd.f32 %v713_v48, %v602_v46  ;;  %v763_v48 = vmul.f32 1.442695, %v744_v35 }
 0x23f   :  { %v749_v31 = vmin.f32 %v1520_v12, 0.0  ;;  %vm733_vm10 = vcmp.gt.f32.partialorder %v1520_v12, 0.0 }
 0x240   :  { %v750_v3 = vmin.f32 %v1523_v19, 0.0  ;;  %vm734_vm11 = vcmp.gt.f32.partialorder %v1523_v19, 0.0 }
 0x241   :  { %v773_v25 = vmul.f32 1.442695, %v749_v31 }
 0x242   :  { %v775_v53 = vmul.f32 1.442695, %v750_v3 }
 0x244   :  { %v675_v54 = vpop.f32.mrf.mxu0 }
 0x245   :  { %v716_v55 = vpop.f32.mrf.mxu1  ;;  %v1510_v59 = vadd.f32 %v675_v54, %v607_v57 }
 0x246   :  { %v1512_v62 = vadd.f32 %v716_v55, %v607_v57  ;;  %v759_v55 = vmul.f32 1.442695, %v742_v41 }
 0x247   :  { %v751_v8 = vmin.f32 %v1510_v59, 0.0  ;;  %vm735_vm8 = vcmp.gt.f32.partialorder %v1510_v59, 0.0 }
 0x248   :  { %v752_v10 = vmin.f32 %v1512_v62, 0.0  ;;  %vm736_vm9 = vcmp.gt.f32.partialorder %v1512_v62, 0.0 }
 0x249   :  { %v777_v49 = vmul.f32 1.442695, %v751_v8 }
 0x24a   :  { %v779_v28 = vmul.f32 1.442695, %v752_v10 }
 0x24b   :  { %1063 = vpow2.f32 %v777_v49 }
 0x24c   :  { %v678_v1 = vpop.f32.mrf.mxu0  ;;  %1065 = vpow2.f32 %v779_v28 }
 0x24d   :  { %v1514_v2 = vadd.f32 %v678_v1, %v612_v50  ;;  %v719_v5 = vpop.f32.mrf.mxu1 }
 0x24e   :  { %v1516_v51 = vadd.f32 %v719_v5, %v612_v50 }
 0x24f   :  { %v753_v16 = vmin.f32 %v1514_v2, 0.0  ;;  %vm737_vm6 = vcmp.gt.f32.partialorder %v1514_v2, 0.0 }
 0x250   :  { %v754_v20 = vmin.f32 %v1516_v51, 0.0  ;;  %vm738_vm7 = vcmp.gt.f32.partialorder %v1516_v51, 0.0 }
 0x251   :  { %v781_v32 = vmul.f32 1.442695, %v753_v16  ;;  %v1064_v37 = vpop.eup %1063 }
 0x252   :  { %v783_v4 = vmul.f32 1.442695, %v754_v20  ;;  %v1066_v40 = vpop.eup %1065  ;;  %v984_v16 = vadd.f32 -1.0, %v1064_v37 }
 0x253   :  { %1067 = vpow2.f32 %v781_v32  ;;  %v985_v49 = vadd.f32 -1.0, %v1066_v40 }
 0x254   :  { %v681_v30 = vpop.f32.mrf.mxu0  ;;  %1069 = vpow2.f32 %v783_v4  ;;  %v815_v63 = vsel %vm735_vm8, %v1510_v59, %v984_v16 }
 0x255   :  { %v682_v58 = vadd.f32 %v681_v30, %v617_v52  ;;  %v722_v17 = vpop.f32.mrf.mxu1 }
 0x256   :  { %v723_v11 = vadd.f32 %v722_v17, %v617_v52  ;;  %v757_v52 = vmul.f32 1.442695, %v741_v38 }
 0x257   :  { %v755_v7 = vmin.f32 %v682_v58, 0.0  ;;  %vm739_vm4 = vcmp.gt.f32.partialorder %v682_v58, 0.0 }
 0x258   :  { %v756_v15 = vmin.f32 %v723_v11, 0.0  ;;  %vm740_vm5 = vcmp.gt.f32.partialorder %v723_v11, 0.0 }
 0x259   :  { %v785_v33 = vmul.f32 1.442695, %v755_v7  ;;  %v1068_v43 = vpop.eup %1067 }
 0x25a   :  { %v787_v14 = vmul.f32 1.442695, %v756_v15  ;;  %v1070_v45 = vpop.eup %1069  ;;  %v986_v57 = vadd.f32 -1.0, %v1068_v43 }
 0x25b   :  { %1071 = vpow2.f32 %v785_v33  ;;  %v987_v5 = vadd.f32 -1.0, %v1070_v45 }
 0x25c   :  { %1073 = vpow2.f32 %v787_v14  ;;  %v817_v28 = vsel %vm737_vm6, %v1514_v2, %v986_v57  ;;  %v816_v2 = vsel %vm736_vm9, %v1512_v62, %v985_v49 }
 0x25d   :  { %1075 = vpow2.f32 %v773_v25  ;;  %v818_v32 = vsel %vm738_vm7, %v1516_v51, %v987_v5 }
 0x25e   :  { %1077 = vpow2.f32 %v775_v53 }
 0x25f   :  { %1079 = vpow2.f32 %v769_v34 }
 0x260   :  { %1081 = vpow2.f32 %v771_v36 }
 0x261   :  { %v1072_v50 = vpop.eup %1071  ;;  %1083 = vpow2.f32 %v765_v39 }
 0x262   :  { %v1074_v54 = vpop.eup %1073  ;;  %1085 = vpow2.f32 %v767_v42  ;;  %v988_v56 = vadd.f32 -1.0, %v1072_v50 }
 0x263   :  { %v1076_v46 = vpop.eup %1075  ;;  %1087 = vpow2.f32 %v761_v44  ;;  %v989_v1 = vadd.f32 -1.0, %v1074_v54 }
 0x264   :  { %v1078_v8 = vpop.eup %1077  ;;  %1089 = vpow2.f32 %v763_v48  ;;  %v819_v10 = vsel %vm739_vm4, %v682_v58, %v988_v56  ;;  %v982_v30 = vadd.f32 -1.0, %v1076_v46  ;;  %vm726_vm4 = vcmp.gt.f32.partialorder %v1530_v27, 0.0 }
 0x265   :  { %v1080_v20 = vpop.eup %1079  ;;  %1091 = vpow2.f32 %v757_v52  ;;  %837 = vmatpush.msra.mxu2 %v819_v10  ;;  %v820_v21 = vsel %vm740_vm5, %v723_v11, %v989_v1  ;;  %v983_v58 = vadd.f32 -1.0, %v1078_v8  ;;  %vm872_vm5 = vcmask 1041408  }
 0x266   :  { %v1082_v24 = vpop.eup %1081  ;;  %1093 = vpow2.f32 %v759_v55  ;;  %857 = vmatpush.msra.mxu3 %v820_v21  ;;  %v980_v3 = vadd.f32 -1.0, %v1080_v20  ;;  %v813_v51 = vsel %vm733_vm10, %v1520_v12, %v982_v30 }
 0x267   :  { %v1084_v31 = vpop.eup %1083  ;;  %838 = vmatpush.msra.mxu2 %v817_v28  ;;  %v981_v11 = vadd.f32 -1.0, %v1082_v24  ;;  %v814_v59 = vsel %vm734_vm11, %v1523_v19, %v983_v58 }
 0x268   :  { %v1086_v17 = vpop.eup %1085  ;;  %858 = vmatpush.msra.mxu3 %v818_v32  ;;  %v978_v7 = vadd.f32 -1.0, %v1084_v31  ;;  %v811_v62 = vsel %vm731_vm12, %v1526_v22, %v980_v3 }
 0x269   :  { %v1088_v4 = vpop.eup %1087  ;;  %839 = vmatpush.msra.mxu2 %v815_v63  ;;  %v979_v15 = vadd.f32 -1.0, %v1086_v17  ;;  %v812_v12 = vsel %vm732_vm13, %v1532_v61, %v981_v11 }
 0x26a   :  { %v1090_v6 = vpop.eup %1089  ;;  %859 = vmatpush.msra.mxu3 %v816_v2  ;;  %v976_v25 = vadd.f32 -1.0, %v1088_v4  ;;  %v809_v29 = vsel %vm729_vm14, %v1534_v0, %v978_v7  ;;  %v81_v0 = vld [vmem:[%s1595_s7] sm:$0x3] }
 0x26b   :  { %v1092_v23 = vpop.eup %1091  ;;  %840 = vmatpush.msra.mxu2 %v813_v51  ;;  %v977_v33 = vadd.f32 -1.0, %v1090_v6  ;;  %v810_v53 = vsel %vm730_vm15, %v1537_v60, %v979_v15 }
 0x26c   :  { %v1094_v47 = vpop.eup %1093  ;;  %860 = vmatpush.msra.mxu3 %v814_v59  ;;  %v974_v19 = vadd.f32 -1.0, %v1092_v23  ;;  %v807_v14 = vsel %vm727_vm0, %v1540_v18, %v976_v25  ;;  %v824_v18 = vpop.permute.xlu0 %823 }
 0x26d   :  { %841 = vmatpush.msra.mxu2 %v811_v62  ;;  %v975_v22 = vadd.f32 -1.0, %v1094_v47  ;;  %v808_v61 = vsel %vm728_vm2, %v1543_v9, %v977_v33 }
 0x26e   :  { %861 = vmatpush.msra.mxu3 %v812_v12  ;;  %v805_v60 = vsel %vm725_vm3, %v1528_v26, %v974_v19 }
 0x26f   :  { %842 = vmatpush.msra.mxu2 %v809_v29  ;;  %v806_v13 = vsel %vm726_vm4, %v1530_v27, %v975_v22 }
 0x270   :  { %862 = vmatpush.msra.mxu3 %v810_v53 }
 0x271   :  { %843 = vmatpush.msra.mxu2 %v807_v14 }
 0x272   :  { %863 = vmatpush.msra.mxu3 %v808_v61 }
 0x273   :  { %844 = vmatpush.msra.mxu2 %v805_v60 }
 0x274   :  { %864 = vmatpush.msra.mxu3 %v806_v13  ;;  %990 = vmatmul.msk.f32.vlgmr.msra.gmra.mxu2 %vm376_vm1, %v81_v0 }
 0x275   :  { %991 = vmatmul.msk.f32.vlgmr.msra.gmra.mxu3 %vm376_vm1, %v81_v0 }
 0x2f7   :  { %v846_v9 = vpop.f32.mrf.mxu2 }
 0x2f8   :  { %v866_v34 = vpop.f32.mrf.mxu3  ;;  %v847_v26 = vadd.f32 %v846_v9, %v824_v18 }
 0x2f9   :  { %v867_v35 = vadd.f32 %v866_v34, %v824_v18 }
 0x2fb   :  { %v871_v36 = vrot.slane %v867_v35, 6 }
 0x2fd   :  { %v873_v27 = vsel %vm872_vm5, %v847_v26, %v871_v36 }
 0x2fe   :  { %875 = vst [vmem:[#allocation2] sm:$0xf] %v873_v27 }
 0x2ff   :  { %886 = dma.vmem_to_hbm [thread:$0]  %s882_s11, 64, %s884_s13, [#allocation3]  }
 0x300   :  { %1119 = dma.done.wait [#allocation3], 64  }
 0x301   :  { %1120 = vsyncadd [#allocation3], 4294967232 }
 0x302   :  { %891 = vsyncpa [#allocation3], 1 }

</bundles_post_ra>
